<compile_context>
chip_gen: v7x
topology: tpu7x:2x2x1
jax: 0.10.0
libtpu: 0.0.40
codegen_flags: <defaults>
</compile_context>

<pallas_src>
import functools

import numpy as np
import jax
import jax.numpy as jnp
from jax.experimental import pallas as pl
from jax.experimental.pallas import tpu as pltpu


def _perm_matrix(height, width, b):
    """(H*W, H*W) 0/1 matrix mapping lane h*W+w -> lane ((hi*b+wi)*Ho+ho)*Wo+wo."""
    ho_n, wo_n = height // b, width // b
    src = np.arange(height * width)
    h, w = src // width, src % width
    ho, hi = h // b, h % b
    wo, wi = w // b, w % b
    dst = ((hi * b + wi) * ho_n + ho) * wo_n + wo
    p = np.zeros((height * width, height * width), dtype=np.float32)
    p[src, dst] = 1.0
    return jnp.asarray(p, dtype=jnp.bfloat16)     # 0.0 / 1.0 are exact in bf16


def _s2d_kernel(x_ref, p_ref, o_ref, *, batch_tile, bb, out_hw, n_parts):
    # x_ref: (TB, C, H*W)   input images, NCHW with spatial flattened into lanes
    # p_ref: (H*W, H*W)     constant bf16 permutation matrix (same block every step)
    # o_ref: (TB, b*b, C, Ho*Wo)  output, free-reshaped view of (B, b*b*C, Ho, Wo)
    perm = p_ref[...]
    for t in range(batch_tile):                      # small static unroll
        x = x_ref[t]                                 # (C, H*W)
        if n_parts == 1:
            # bf16 input: one exact MXU matmul (0/1 weights, f32 accumulate).
            y = jnp.dot(x, perm, preferred_element_type=jnp.float32)
        else:
            # f32/f16 input: exact 3-way bf16 residual split, 3 exact matmuls, exact re-sum.
            xf = x.astype(jnp.float32)
            p1 = xf.astype(jnp.bfloat16)
            r1 = xf - p1.astype(jnp.float32)
            p2 = r1.astype(jnp.bfloat16)
            r2 = r1 - p2.astype(jnp.float32)
            p3 = r2.astype(jnp.bfloat16)             # r2 has <= 8 significant bits: exact
            y1 = jnp.dot(p1, perm, preferred_element_type=jnp.float32)
            y2 = jnp.dot(p2, perm, preferred_element_type=jnp.float32)
            y3 = jnp.dot(p3, perm, preferred_element_type=jnp.float32)
            y = y1 + (y2 + y3)                       # this order is provably exact
        # After the matmul the lane order is (hi, wi, ho, wo); each (hi, wi) slab is a
        # contiguous, static lane range -> unmasked stores into the contiguous NCHW block.
        for k in range(bb):
            o_ref[t, k] = y[:, k * out_hw:(k + 1) * out_hw].astype(o_ref.dtype)


def _pick_batch_tile(batch, per_image_bytes, *, target_bytes=1 << 20, max_unroll=8):
    want = int(max(1, min(max_unroll, target_bytes // max(1, per_image_bytes))))
    if batch >= 2:
        want = min(want, batch // 2)   # keep >= 2 grid steps so both v7x TCs get work
    want = max(1, want)
    best = 1
    for cand in range(1, want + 1):
        if batch % cand == 0:
            best = cand
    return best


def _space_to_depth_xla(x, b):
    """Pure-JAX fallback / reference (mirrors the PyTorch forward exactly)."""
    bsz, chan, height, width = x.shape
    o = jnp.transpose(x, (0, 2, 3, 1))
    o = o.reshape(bsz, height // b, b, width // b, b, chan)
    o = jnp.transpose(o, (0, 1, 3, 2, 4, 5))
    o = o.reshape(bsz, height // b, width // b, b * b * chan)
    return jnp.transpose(o, (0, 3, 1, 2))


def space_to_depth(x, block_size):
    """SpaceToDepth matching the PyTorch module: NCHW in, NCHW out, dtype preserved."""
    assert x.ndim == 4
    bsz, chan, height, width = x.shape
    b = block_size
    assert height % b == 0 and width % b == 0
    ho_n, wo_n = height // b, width // b
    bb = b * b
    hw = height * width
    out_hw = ho_n * wo_n
    dt = x.dtype
    itemsize = jnp.dtype(dt).itemsize

    if (not jnp.issubdtype(dt, jnp.floating)) or hw > 1024:
        # TODO(synk): integer dtypes / very large spatial dims take the plain XLA path.
        return _space_to_depth_xla(x, b)

    n_parts = 1 if dt == jnp.bfloat16 else 3
    tb = _pick_batch_tile(bsz, chan * hw * itemsize)
    grid = (bsz // tb,)

    x3 = x.reshape(bsz, chan, hw)                    # free row-major reshape (no HBM pass)
    perm = _perm_matrix(height, width, b)

    kernel = functools.partial(
        _s2d_kernel, batch_tile=tb, bb=bb, out_hw=out_hw, n_parts=n_parts
    )
    data_bytes = bsz * chan * hw * itemsize
    cost = pl.CostEstimate(
        flops=int(2 * bsz * chan * hw * hw * n_parts),
        transcendentals=0,
        bytes_accessed=int(2 * data_bytes + perm.size * 2),
    )

    out = pl.pallas_call(
        kernel,
        out_shape=jax.ShapeDtypeStruct((bsz, bb, chan, out_hw), dt),
        grid_spec=pltpu.PrefetchScalarGridSpec(
            num_scalar_prefetch=0,
            grid=grid,
            in_specs=[
                pl.BlockSpec((tb, chan, hw), lambda i: (i, 0, 0)),
                pl.BlockSpec((hw, hw), lambda i: (0, 0)),   # same block every step: no refetch
            ],
            out_specs=pl.BlockSpec((tb, bb, chan, out_hw), lambda i: (i, 0, 0, 0)),
        ),
        compiler_params=pltpu.CompilerParams(
            dimension_semantics=("parallel",),
            vmem_limit_bytes=32 * 1024 * 1024,
        ),
        cost_estimate=cost,
    )(x3, perm)

    # Free row-major reshape back to the module's NCHW contract: (B, b*b*C, Ho, Wo).
    return out.reshape(bsz, bb * chan, ho_n, wo_n)


if __name__ == "__main__":
    key = jax.random.PRNGKey(0)

    # Primary case.
    x = jax.random.normal(key, (2, 4, 16, 16), dtype=jnp.float32)
    out = jax.block_until_ready(space_to_depth(x, 2))
    assert out.shape == (2, 16, 8, 8) and out.dtype == x.dtype
    assert jnp.array_equal(out, _space_to_depth_xla(x, 2)), "mismatch (f32, b=2)"

    # Robustness: odd channel count + bf16 packing, and a block size other than 2.
    k1, k2 = jax.random.split(key)
    x_bf16 = jax.random.normal(k1, (2, 3, 8, 8), dtype=jnp.bfloat16)
    out_bf16 = jax.block_until_ready(space_to_depth(x_bf16, 2))
    assert out_bf16.shape == (2, 12, 4, 4) and out_bf16.dtype == jnp.bfloat16
    assert jnp.array_equal(out_bf16, _space_to_depth_xla(x_bf16, 2)), "mismatch (bf16, b=2)"

    x_b3 = jax.random.normal(k2, (1, 8, 12, 12), dtype=jnp.float32)
    out_b3 = jax.block_until_ready(space_to_depth(x_b3, 3))
    assert out_b3.shape == (1, 72, 4, 4) and out_b3.dtype == x_b3.dtype
    assert jnp.array_equal(out_b3, _space_to_depth_xla(x_b3, 3)), "mismatch (f32, b=3)"

    print("KERNEL_OK")
</pallas_src>

<mosaic_0001>
module attributes {stable_mosaic.version = 11 : i64} {
  func.func @_s2d_kernel(%arg0: i32, %arg1: memref<1x4x256xf32, #tpu.memory_space<vmem>>, %arg2: memref<256x256xbf16, #tpu.memory_space<vmem>>, %arg3: memref<1x4x4x64xf32, #tpu.memory_space<vmem>>) attributes {dimension_semantics = [#tpu.dimension_semantics<parallel>], iteration_bounds = array<i64: 2>, scalar_prefetch = 0 : i64, scratch_operands = 0 : i64, tpu.core_type = #tpu.core_type<tc>, window_params = [{transform_indices = @transform_0, window_bounds = array<i64: 1, 4, 256>}, {pipeline_mode = #tpu.pipeline_mode<synchronous>, transform_indices = @transform_1, window_bounds = array<i64: 256, 256>}, {transform_indices = @transform_2, window_bounds = array<i64: 1, 4, 4, 64>}]} {
    %c0 = arith.constant 0 : index
    %c0_0 = arith.constant 0 : index
    %0 = vector.load %arg2[%c0, %c0_0] : memref<256x256xbf16, #tpu.memory_space<vmem>>, vector<256x256xbf16>
    %c0_1 = arith.constant 0 : index
    %c0_2 = arith.constant 0 : index
    %c0_3 = arith.constant 0 : index
    %1 = vector.load %arg1[%c0_1, %c0_2, %c0_3] : memref<1x4x256xf32, #tpu.memory_space<vmem>>, vector<1x4x256xf32>
    %2 = vector.shape_cast %1 : vector<1x4x256xf32> to vector<4x256xf32>
    %3 = arith.truncf %2 : vector<4x256xf32> to vector<4x256xbf16>
    %4 = arith.extf %3 : vector<4x256xbf16> to vector<4x256xf32>
    %5 = arith.subf %2, %4 : vector<4x256xf32>
    %6 = arith.truncf %5 : vector<4x256xf32> to vector<4x256xbf16>
    %7 = arith.extf %6 : vector<4x256xbf16> to vector<4x256xf32>
    %8 = arith.subf %5, %7 : vector<4x256xf32>
    %9 = arith.truncf %8 : vector<4x256xf32> to vector<4x256xbf16>
    %cst = arith.constant dense<0.000000e+00> : vector<4x256xf32>
    %10 = tpu.matmul %3, %0, %cst {dimension_numbers = #tpu.dot_dimension_numbers<[1], [0], [0], [1], [0, 0, 1, 1], [], []>} : vector<4x256xbf16>, vector<256x256xbf16>, vector<4x256xf32> -> vector<4x256xf32>
    %cst_4 = arith.constant dense<0.000000e+00> : vector<4x256xf32>
    %11 = tpu.matmul %6, %0, %cst_4 {dimension_numbers = #tpu.dot_dimension_numbers<[1], [0], [0], [1], [0, 0, 1, 1], [], []>} : vector<4x256xbf16>, vector<256x256xbf16>, vector<4x256xf32> -> vector<4x256xf32>
    %cst_5 = arith.constant dense<0.000000e+00> : vector<4x256xf32>
    %12 = tpu.matmul %9, %0, %cst_5 {dimension_numbers = #tpu.dot_dimension_numbers<[1], [0], [0], [1], [0, 0, 1, 1], [], []>} : vector<4x256xbf16>, vector<256x256xbf16>, vector<4x256xf32> -> vector<4x256xf32>
    %13 = arith.addf %11, %12 : vector<4x256xf32>
    %14 = arith.addf %10, %13 : vector<4x256xf32>
    %15 = vector.extract_strided_slice %14 {offsets = [0, 0], sizes = [4, 64], strides = [1, 1]} : vector<4x256xf32> to vector<4x64xf32>
    %c0_6 = arith.constant 0 : index
    %c0_7 = arith.constant 0 : index
    %c0_8 = arith.constant 0 : index
    %c0_9 = arith.constant 0 : index
    %16 = vector.load %arg3[%c0_6, %c0_7, %c0_8, %c0_9] : memref<1x4x4x64xf32, #tpu.memory_space<vmem>>, vector<1x1x4x64xf32>
    %17 = vector.shape_cast %16 : vector<1x1x4x64xf32> to vector<4x64xf32>
    %18 = vector.shape_cast %15 : vector<4x64xf32> to vector<1x1x4x64xf32>
    tpu.vector_store %arg3[%c0_6, %c0_7, %c0_8, %c0_9], %18 {strides = array<i32>} : memref<1x4x4x64xf32, #tpu.memory_space<vmem>>, vector<1x1x4x64xf32>,
    %19 = vector.extract_strided_slice %14 {offsets = [0, 64], sizes = [4, 64], strides = [1, 1]} : vector<4x256xf32> to vector<4x64xf32>
    %c0_10 = arith.constant 0 : index
    %c1 = arith.constant 1 : index
    %c0_11 = arith.constant 0 : index
    %c0_12 = arith.constant 0 : index
    %20 = vector.load %arg3[%c0_10, %c1, %c0_11, %c0_12] : memref<1x4x4x64xf32, #tpu.memory_space<vmem>>, vector<1x1x4x64xf32>
    %21 = vector.shape_cast %20 : vector<1x1x4x64xf32> to vector<4x64xf32>
    %22 = vector.shape_cast %19 : vector<4x64xf32> to vector<1x1x4x64xf32>
    tpu.vector_store %arg3[%c0_10, %c1, %c0_11, %c0_12], %22 {strides = array<i32>} : memref<1x4x4x64xf32, #tpu.memory_space<vmem>>, vector<1x1x4x64xf32>,
    %23 = vector.extract_strided_slice %14 {offsets = [0, 128], sizes = [4, 64], strides = [1, 1]} : vector<4x256xf32> to vector<4x64xf32>
    %c0_13 = arith.constant 0 : index
    %c2 = arith.constant 2 : index
    %c0_14 = arith.constant 0 : index
    %c0_15 = arith.constant 0 : index
    %24 = vector.load %arg3[%c0_13, %c2, %c0_14, %c0_15] : memref<1x4x4x64xf32, #tpu.memory_space<vmem>>, vector<1x1x4x64xf32>
    %25 = vector.shape_cast %24 : vector<1x1x4x64xf32> to vector<4x64xf32>
    %26 = vector.shape_cast %23 : vector<4x64xf32> to vector<1x1x4x64xf32>
    tpu.vector_store %arg3[%c0_13, %c2, %c0_14, %c0_15], %26 {strides = array<i32>} : memref<1x4x4x64xf32, #tpu.memory_space<vmem>>, vector<1x1x4x64xf32>,
    %27 = vector.extract_strided_slice %14 {offsets = [0, 192], sizes = [4, 64], strides = [1, 1]} : vector<4x256xf32> to vector<4x64xf32>
    %c0_16 = arith.constant 0 : index
    %c3 = arith.constant 3 : index
    %c0_17 = arith.constant 0 : index
    %c0_18 = arith.constant 0 : index
    %28 = vector.load %arg3[%c0_16, %c3, %c0_17, %c0_18] : memref<1x4x4x64xf32, #tpu.memory_space<vmem>>, vector<1x1x4x64xf32>
    %29 = vector.shape_cast %28 : vector<1x1x4x64xf32> to vector<4x64xf32>
    %30 = vector.shape_cast %27 : vector<4x64xf32> to vector<1x1x4x64xf32>
    tpu.vector_store %arg3[%c0_16, %c3, %c0_17, %c0_18], %30 {strides = array<i32>} : memref<1x4x4x64xf32, #tpu.memory_space<vmem>>, vector<1x1x4x64xf32>,
    return
  }
  func.func @transform_0(%arg0: i32) -> (i32, i32, i32) {
    %c0_i32 = arith.constant 0 : i32
    %c0_i32_0 = arith.constant 0 : i32
    %c0_i32_1 = arith.constant 0 : i32
    return %arg0, %c0_i32, %c0_i32_0 : i32, i32, i32
  }
  func.func @transform_1(%arg0: i32) -> (i32, i32) {
    %c0_i32 = arith.constant 0 : i32
    %c0_i32_0 = arith.constant 0 : i32
    %c0_i32_1 = arith.constant 0 : i32
    return %c0_i32, %c0_i32_0 : i32, i32
  }
  func.func @transform_2(%arg0: i32) -> (i32, i32, i32, i32) {
    %c0_i32 = arith.constant 0 : i32
    %c0_i32_0 = arith.constant 0 : i32
    %c0_i32_1 = arith.constant 0 : i32
    %c0_i32_2 = arith.constant 0 : i32
    return %arg0, %c0_i32, %c0_i32_0, %c0_i32_1 : i32, i32, i32, i32
  }
}

</mosaic_0001>

<bundles_post_ra>
// kernel: tpu_custom_call.1
= control target key start
LH: loop header
LB: loop body
LE: loop exit
PB: predicated region body
PF: predicated region fallthrough
CT: control target
= control target key end

     0   :  { %7 = vsyncpa [#allocation3], 0  ;;  %s1282_s0 = inlined_call_operand.hbm [shape: f32[2,4,256], index: 0, kind: input, shape index: {}]   ;;  %s1283_s1 = inlined_call_operand.hbm [shape: bf16[256,256], index: 1, kind: input, shape index: {}]   ;;  %s1284_s2 = inlined_call_operand.hbm [shape: f32[2,4,4,64], index: 2, kind: output, shape index: {}]  }
   0x1   :  { %9 = vsyncpa [#allocation3 + $0x1], 0 }
   0x2   :  { %10 = vsyncpa [#allocation6], 0 }
   0x3   :  { %11 = vsyncpa [#allocation4], 0 }
   0x4   :  { %13 = vsyncpa [#allocation4 + $0x1], 0  ;;  %s954_s9 = smov 0   ;;  %s956_s10 = smov 0  }
   0x5   :  { %s958_s11 = smov 0   ;;  %s960_s12 = smov 0  }
   0x6 LB: > { %s975_s13 = sadd.s32 4294967295, %s930_s12   ;;  %s633_s14 = sadd.s32 4294967294, %s930_s12   ;;  %s930_s12 = sphi %s960_s12, %s1304_s12   ;;  %s926_s11 = sphi %s958_s11, %s1303_s11   ;;  %s922_s10 = sphi %s956_s10, %s1302_s10   ;;  %s918_s9 = sphi %s954_s9, %s1301_s9  }
   0x7   : > { %p39_p0 = scmp.ne.s32.totalorder %s922_s10, %s918_s9  ;;  %p1285_p1 = scmp.eq.s32.totalorder %s975_s13, 0 }
   0x8   : > { %p90_p3 = scmp.eq.s32.totalorder %s633_s14, 1  ;;  %p634_p5 = scmp.ge.s32.totalorder %s930_s12, 1 }
   0x9   : > { %p984_p4 = por %p1285_p1, %p39_p0  ;;  %p97_p7 = scmp.lt.s32.totalorder %s930_s12, 3 }
   0xa   : > { %p989_p6 = por %p90_p3, %p39_p0  ;;  %s932_s18 = smov [#allocation5]  }
   0xb   : > { %s1288_s15 = scalar_select %p984_p4, 1, 0 }
   0xc   : > { %s1289_s16 = scalar_select %p989_p6, 1, 0 }
   0xd   : > { %p994_p8 = pnand %p634_p5, %p97_p7  ;;  %s109_s19 = sshll.u32 %s932_s18, 4  ;;  %s998_s19 = int_to_ptr.vmem [resolvable:$true] %s109_s19 }
   0xe   : > { %s1010_s21 = sadd.s32 1, %s930_s12   ;;  %s26_s22 = sadd.s32 1, %s926_s11 }
   0xf   : > { %s1290_s17 = scalar_select %p994_p8, 1, 0 }
  0x10   : > { %p700_p9 = pneg %p994_p8  ;;  %s23_s23 = ssub.s32 %s930_s12, %s1010_s21 }
  0x11   : > { %s802_s26 = scalar_lea.hbm %s1283_s1, 4096 }
  0x12   : > { %p1005_p11 = pnand %p700_p9, %p1285_p1  ;;  %p803_p12 = scmp.ne.s32.totalorder %s1283_s1, %s802_s26 }
  0x13   : > { %p809_p5 = scmp.lt.u32.totalorder %s802_s26, %s1283_s1 }
  0x14   : > { %p804_p13 = pneg %p1005_p11 }
  0x16   : > { %p805_p0 = pnand %p804_p13, %p803_p12 }
  0x18   : > { %p806_p3 = pneg %p805_p0 }
  0x1a   : > { %p811_p7 = pnand %p809_p5, %p806_p3 }
  0x1c   : > { %814 = shalt.err (!%p811_p7)
}
  0x1d   : > { %s815_s3 = scalar_lea.vmem %s998_s19, 4096  ;;  %p823_p2 = scmp.lt.s32.totalorder %s998_s19, %s998_s19 }
  0x1e   : > { %p816_p9 = scmp.ne.s32.totalorder %s998_s19, %s815_s3  ;;  %p824_p6 = scmp.lt.s32.totalorder %s815_s3, %s815_s3 }
  0x20   : > { %p818_p10 = pnand %p816_p9, %p804_p13  ;;  %p825_p4 = por %p824_p6, %p823_p2 }
  0x22   : > { %p819_p1 = pneg %p818_p10 }
  0x24   : > { %p826_p8 = pnand %p825_p4, %p819_p1 }
  0x26   : > { %829 = shalt.err (!%p826_p8)
}
  0x27   : > { %s933_s4 = smov 128   ;;  %s934_s5 = smov 8  }
  0x28   : > { %703 = dma.hbm_to_vmem [thread:$0]  (!%p1005_p11), %s1283_s1, 4096, %s998_s19, [#allocation6], %s933_s4, %s933_s4, %s934_s5  }
  0x29   : > { %p24_p2 = scmp.eq.s32.totalorder %s23_s23, 0  ;;  %p33_p1 = scmp.ne.s32.totalorder %s926_s11, %s922_s10 }
  0x2a   : > { %p34_p4 = scmp.eq.s32.totalorder %s930_s12, 0  ;;  %p713_p6 = scmp.lt.s32.totalorder %s930_s12, 2 }
  0x2b   : > { %s1041_s8 = scalar_select %p24_p2, %s926_s11, %s26_s22  }
  0x2c   : > { %p35_p8 = por %p34_p4, %p33_p1  ;;  %p1292_p10 = scmp.eq.s32.totalorder %s975_s13, 1 }
  0x2d   : > { %s123_s18 = sand.u32 1, %s926_s11   ;;  %s684_s24 = sshll.u32 %s930_s12, 7 }
  0x2e   : > { %p1045_p12 = por %p1292_p10, %p33_p1  ;;  %s637_s25 = sshll.u32 %s123_s18, 3 }
  0x2f   : > { %s1054_s27 = scalar_lea.hbm %s1282_s0, %s684_s24  ;;  %s127_s19 = scalar_lea.vmem [#allocation2], %s637_s25 }
  0x30   : > { %s135_s22 = sshll.u32 %s127_s19, 4  ;;  %p1056_p11 = pnand %p713_p6, %p35_p8  ;;  %s1060_s22 = int_to_ptr.vmem [resolvable:$true] %s135_s22 }
  0x31   : > { %s124_s28 = scalar_lea.sflag [#allocation3], %s123_s18  ;;  %s830_s29 = scalar_lea.hbm %s1054_s27, 128 }
  0x32   : > { %p831_p13 = scmp.ne.s32.totalorder %s1054_s27, %s830_s29  ;;  %p832_p0 = pneg %p1056_p11 }
  0x33   : > { %s835_s4 = scalar_lea.hbm %s1282_s0, 256  ;;  %p836_p7 = scmp.lt.u32.totalorder %s1054_s27, %s1282_s0 }
  0x34   : > { %p833_p3 = pnand %p832_p0, %p831_p13  ;;  %p837_p9 = scmp.lt.u32.totalorder %s835_s4, %s830_s29 }
  0x35   : > { %p839_p1 = scmp.lt.u32.totalorder %s830_s29, %s1054_s27 }
  0x36   : > { %p834_p5 = pneg %p833_p3  ;;  %p838_p2 = por %p837_p9, %p836_p7 }
  0x38   : > { %p840_p4 = por %p839_p1, %p838_p2 }
  0x3a   : > { %p841_p6 = pnand %p840_p4, %p834_p5 }
  0x3c   : > { %844 = shalt.err (!%p841_p6)
}
  0x3d   : > { %s845_s7 = scalar_lea.vmem %s1060_s22, 128  ;;  %s935_s18 = smov [#allocation2]  }
  0x3e   : > { %p846_p8 = scmp.ne.s32.totalorder %s1060_s22, %s845_s7  ;;  %s850_s24 = sshll.u32 %s935_s18, 4  ;;  %s851_s24 = int_to_ptr.vmem [resolvable:$false] %s850_s24 }
  0x3f   : > { %s852_s25 = scalar_lea.vmem %s851_s24, 256  ;;  %p853_p3 = scmp.lt.s32.totalorder %s1060_s22, %s851_s24 }
  0x40   : > { %p848_p10 = pnand %p846_p8, %p832_p0  ;;  %p854_p7 = scmp.lt.s32.totalorder %s852_s25, %s845_s7 }
  0x42   : > { %p849_p13 = pneg %p848_p10  ;;  %p855_p9 = por %p854_p7, %p853_p3 }
  0x44   : > { %p856_p2 = pnand %p855_p9, %p849_p13 }
  0x46   : > { %859 = shalt.err (!%p856_p2)
}
  0x47   : > { %707 = dma.hbm_to_vmem [thread:$0]  (!%p1056_p11), %s1054_s27, 128, %s1060_s22, %s124_s28  }
  0x48   : > { %p1295_p5 = scmp.ne.s32.totalorder %s1290_s17, 0 }
  0x49   : > { %s1090_s20 = sand.u32 (!%p1295_p5), 1, %s922_s10   ;;  %p1296_p0 = scmp.ne.s32.totalorder (!%p1295_p5), %s1288_s15, 0 }
  0x4a   : > { %144 = sbr.rel (%p1295_p5) target bundleno = 562 (0x232), region = 28  ;;  %s641_s26 = sshll.u32 (!%p1295_p5), %s1090_s20, 3 }
  0x4b   : > { %s147_s19 = scalar_lea.sflag (!%p1295_p5), [#allocation3], %s1090_s20  ;;  %s1094_s29 = scalar_lea.vmem (!%p1295_p5), [#allocation2], %s641_s26 }
  0x51   : > { %905 = dma.done.wait (%p1296_p0), %s147_s19, 128  }
  0x52   : > { %907 = vsyncadd (%p1296_p0), %s147_s19, 4294967168  ;;  %p1297_p11 = scmp.eq.s32.totalorder %s975_s13, 0 }
  0x54   : > { %909 = dma.done.wait (%p1297_p11), [#allocation6], 4096   ;;  %p1298_p1 = pmov %p1297_p11 }
  0x55   : > { %v1104_v0 = vld [vmem:[#allocation5 + $0x4] ss:$8 sps:$4 sm:$0xff]   ;;  %v1106_v1 = vld [vmem:[#allocation5] ss:$8 sps:$4 sm:$0xff]   ;;  %v1109_v2 = vld [vmem:[#allocation5 + $0x14] ss:$8 sps:$4 sm:$0xff]  }
  0x56   : > { %911 = vsyncadd (%p1298_p1), [#allocation6], 4294963200  ;;  %438 = vmatprep.subr.bf16.mxu0 %v1104_v0  ;;  %397 = vmatprep.subr.bf16.mxu1 %v1104_v0  ;;  %v1113_v3 = vld [vmem:[#allocation5 + $0x10] ss:$8 sps:$4 sm:$0xff]   ;;  %v1117_v4 = vld [vmem:[#allocation5 + $0x24] ss:$8 sps:$4 sm:$0xff]  }
  0x57   : > { %439 = vmatpush1.bf16.msra.mxu0 %v1106_v1  ;;  %398 = vmatpush1.bf16.msra.mxu1 %v1106_v1  ;;  %v1121_v5 = vld [vmem:[#allocation5 + $0x20] ss:$8 sps:$4 sm:$0xff]   ;;  %v1125_v6 = vld [vmem:[#allocation5 + $0x34] ss:$8 sps:$4 sm:$0xff]   ;;  %v1129_v7 = vld [vmem:[#allocation5 + $0x30] ss:$8 sps:$4 sm:$0xff]  }
  0x58   : > { %440 = vmatprep.subr.bf16.mxu0 %v1109_v2  ;;  %399 = vmatprep.subr.bf16.mxu1 %v1109_v2  ;;  %v1133_v8 = vld [vmem:[#allocation5 + $0x44] ss:$8 sps:$4 sm:$0xff]   ;;  %v1137_v9 = vld [vmem:[#allocation5 + $0x40] ss:$8 sps:$4 sm:$0xff]   ;;  %v1141_v10 = vld [vmem:[#allocation5 + $0x54] ss:$8 sps:$4 sm:$0xff]  }
  0x59   : > { %v1145_v11 = vld [vmem:[#allocation5 + $0x50] ss:$8 sps:$4 sm:$0xff]   ;;  %v1149_v12 = vld [vmem:[#allocation5 + $0x64] ss:$8 sps:$4 sm:$0xff]   ;;  %v1156_v16 = vld [vmem:[#allocation5 + $0x60] ss:$8 sps:$4 sm:$0xff]  }
  0x5a   : > { %v207_v13 = vld [vmem:[%s1094_s29] sm:$0xff]  ;;  %v1172_v22 = vld [vmem:[#allocation5 + $0x84] ss:$8 sps:$4 sm:$0xff]   ;;  %v1176_v25 = vld [vmem:[#allocation5 + $0x80] ss:$8 sps:$4 sm:$0xff]   ;;  %s643_s15 = sshll.u32 %s1090_s20, 4 }
  0x5b   : > { %441 = vmatpush1.bf16.msra.mxu0 %v1113_v3  ;;  %400 = vmatpush1.bf16.msra.mxu1 %v1113_v3  ;;  %v209_v14 = vcombine.high %v207_v13, %v207_v13  ;;  %v1153_v15 = vpack.c.bf16 %v207_v13, %v207_v13  ;;  %v1160_v17 = vld [vmem:[#allocation5 + $0x74] ss:$8 sps:$4 sm:$0xff]   ;;  %v1168_v21 = vld [vmem:[#allocation5 + $0x70] ss:$8 sps:$4 sm:$0xff]   ;;  %v1188_v32 = vld [vmem:[#allocation5 + $0xa4] ss:$8 sps:$4 sm:$0xff]  }
  0x5c   : > { %442 = vmatprep.subr.bf16.mxu0 %v1117_v4  ;;  %401 = vmatprep.subr.bf16.mxu1 %v1117_v4  ;;  %v1180_v26 = vld [vmem:[#allocation5 + $0x94] ss:$8 sps:$4 sm:$0xff]   ;;  %v1184_v31 = vld [vmem:[#allocation5 + $0x90] ss:$8 sps:$4 sm:$0xff]   ;;  %v1192_v35 = vld [vmem:[#allocation5 + $0xa0] ss:$8 sps:$4 sm:$0xff]  }
  0x5d   : > { %v1162_v18 = vpack.c.bf16 %v209_v14, %v209_v14  ;;  %v213_v19 = vunpack.c.l.bf16 %v1153_v15  ;;  %v786_v36 = vld [vmem:[#allocation5 + $0xb4] ss:$8 sps:$4 sm:$0xff]   ;;  %v788_v39 = vld [vmem:[#allocation5 + $0xb0] ss:$8 sps:$4 sm:$0xff]   ;;  %v789_v40 = vld [vmem:[#allocation5 + $0xc4] ss:$8 sps:$4 sm:$0xff]  }
  0x5e   : > { %v791_v42 = vld [vmem:[#allocation5 + $0xc0] ss:$8 sps:$4 sm:$0xff]   ;;  %v792_v43 = vld [vmem:[#allocation5 + $0xd4] ss:$8 sps:$4 sm:$0xff]   ;;  %v794_v44 = vld [vmem:[#allocation5 + $0xd0] ss:$8 sps:$4 sm:$0xff]  }
  0x5f   : > { %443 = vmatpush1.bf16.msra.mxu0 %v1121_v5  ;;  %402 = vmatpush1.bf16.msra.mxu1 %v1121_v5  ;;  %v214_v20 = vunpack.c.l.bf16 %v1162_v18  ;;  %v795_v45 = vld [vmem:[#allocation5 + $0xe4] ss:$8 sps:$4 sm:$0xff]   ;;  %v797_v46 = vld [vmem:[#allocation5 + $0xe0] ss:$8 sps:$4 sm:$0xff]   ;;  %v798_v47 = vld [vmem:[#allocation5 + $0xf4] ss:$8 sps:$4 sm:$0xff]  }
  0x60   : > { %444 = vmatprep.subr.bf16.mxu0 %v1125_v6  ;;  %403 = vmatprep.subr.bf16.mxu1 %v1125_v6  ;;  %v800_v48 = vld [vmem:[#allocation5 + $0xf0] ss:$8 sps:$4 sm:$0xff]   ;;  %vm520_vm0 = vcmask 519168   ;;  %s936_s17 = smov 64   ;;  %s174_s27 = scalar_lea.vmem [#allocation7], %s643_s15 }
  0x61   : > { %v217_v23 = vcombine.low %v213_v19, %v214_v20  ;;  %s550_s22 = sshll.u32 %s174_s27, 4  ;;  %s685_s23 = sshll.u32 %s975_s13, 8  ;;  %s1230_s22 = int_to_ptr.vmem [resolvable:$true] %s550_s22 }
  0x62   : > { %s1235_s3 = scalar_lea.hbm %s1284_s2, %s685_s23  ;;  %s537_s4 = scalar_lea.sflag [#allocation4], %s1090_s20 }
  0x63   : > { %445 = vmatpush1.bf16.msra.mxu0 %v1129_v7  ;;  %404 = vmatpush1.bf16.msra.mxu1 %v1129_v7  ;;  %v219_v24 = vsub.f32 %v207_v13, %v217_v23  ;;  %s860_s5 = scalar_lea.vmem %s1230_s22, 256  ;;  %s937_s13 = smov [#allocation7]  }
  0x64   : > { %446 = vmatprep.subr.bf16.mxu0 %v1133_v8  ;;  %405 = vmatprep.subr.bf16.mxu1 %v1133_v8  ;;  %p861_p4 = scmp.ne.s32.totalorder %s1230_s22, %s860_s5  ;;  %s864_s6 = sshll.u32 %s937_s13, 4  ;;  %s865_s6 = int_to_ptr.vmem [resolvable:$false] %s864_s6 }
  0x65   : > { %v221_v27 = vcombine.high %v219_v24, %v219_v24  ;;  %v223_v28 = vpack.c.bf16 %v219_v24, %v219_v24  ;;  %s866_s7 = scalar_lea.vmem %s865_s6, 512  ;;  %p867_p10 = scmp.lt.s32.totalorder %s1230_s22, %s865_s6 }
  0x66   : > { %p862_p6 = pnand %p861_p4, %p1045_p12  ;;  %p868_p13 = scmp.lt.s32.totalorder %s866_s7, %s860_s5 }
  0x67   : > { %447 = vmatpush1.bf16.msra.mxu0 %v1137_v9  ;;  %406 = vmatpush1.bf16.msra.mxu1 %v1137_v9  ;;  %v224_v29 = vpack.c.bf16 %v221_v27, %v221_v27  ;;  %v225_v30 = vunpack.c.l.bf16 %v223_v28 }
  0x68   : > { %448 = vmatprep.subr.bf16.mxu0 %v1141_v10  ;;  %407 = vmatprep.subr.bf16.mxu1 %v1141_v10  ;;  %p863_p8 = pneg %p862_p6  ;;  %p869_p3 = por %p868_p13, %p867_p10 }
  0x69   : > { %v226_v33 = vunpack.c.l.bf16 %v224_v29  ;;  %470 = vmatprep.mubr.bf16.mxu0 %v224_v29 }
  0x6a   : > { %p870_p7 = pnand %p869_p3, %p863_p8 }
  0x6b   : > { %449 = vmatpush1.bf16.msra.mxu0 %v1145_v11  ;;  %408 = vmatpush1.bf16.msra.mxu1 %v1145_v11  ;;  %v229_v34 = vcombine.low %v225_v30, %v226_v33 }
  0x6c   : > { %450 = vmatprep.subr.bf16.mxu0 %v1149_v12  ;;  %409 = vmatprep.subr.bf16.mxu1 %v1149_v12 }
  0x6d   : > { %v231_v37 = vsub.f32 %v219_v24, %v229_v34 }
  0x6f   : > { %451 = vmatpush1.bf16.msra.mxu0 %v1156_v16  ;;  %410 = vmatpush1.bf16.msra.mxu1 %v1156_v16  ;;  %v233_v38 = vcombine.high %v231_v37, %v231_v37  ;;  %v235_v49 = vpack.c.bf16 %v231_v37, %v231_v37 }
  0x70   : > { %452 = vmatprep.subr.bf16.mxu0 %v1160_v17  ;;  %411 = vmatprep.subr.bf16.mxu1 %v1160_v17 }
  0x71   : > { %v236_v41 = vpack.c.bf16 %v233_v38, %v233_v38 }
  0x73   : > { %453 = vmatpush1.bf16.msra.mxu0 %v1168_v21  ;;  %412 = vmatpush1.bf16.msra.mxu1 %v1168_v21 }
  0x74   : > { %454 = vmatprep.subr.bf16.mxu0 %v1172_v22  ;;  %413 = vmatprep.subr.bf16.mxu1 %v1172_v22 }
  0x75   : > { %429 = vmatprep.mubr.bf16.mxu1 %v236_v41 }
  0x77   : > { %455 = vmatpush1.bf16.msra.mxu0 %v1176_v25  ;;  %414 = vmatpush1.bf16.msra.mxu1 %v1176_v25 }
  0x78   : > { %456 = vmatprep.subr.bf16.mxu0 %v1180_v26  ;;  %415 = vmatprep.subr.bf16.mxu1 %v1180_v26 }
  0x7b   : > { %457 = vmatpush1.bf16.msra.mxu0 %v1184_v31  ;;  %416 = vmatpush1.bf16.msra.mxu1 %v1184_v31 }
  0x7c   : > { %458 = vmatprep.subr.bf16.mxu0 %v1188_v32  ;;  %417 = vmatprep.subr.bf16.mxu1 %v1188_v32 }
  0x7f   : > { %459 = vmatpush1.bf16.msra.mxu0 %v1192_v35  ;;  %418 = vmatpush1.bf16.msra.mxu1 %v1192_v35 }
  0x80   : > { %460 = vmatprep.subr.bf16.mxu0 %v786_v36  ;;  %419 = vmatprep.subr.bf16.mxu1 %v786_v36 }
  0x83   : > { %461 = vmatpush1.bf16.msra.mxu0 %v788_v39  ;;  %420 = vmatpush1.bf16.msra.mxu1 %v788_v39 }
  0x84   : > { %462 = vmatprep.subr.bf16.mxu0 %v789_v40  ;;  %421 = vmatprep.subr.bf16.mxu1 %v789_v40 }
  0x87   : > { %463 = vmatpush1.bf16.msra.mxu0 %v791_v42  ;;  %422 = vmatpush1.bf16.msra.mxu1 %v791_v42 }
  0x88   : > { %464 = vmatprep.subr.bf16.mxu0 %v792_v43  ;;  %423 = vmatprep.subr.bf16.mxu1 %v792_v43 }
  0x8b   : > { %465 = vmatpush1.bf16.msra.mxu0 %v794_v44  ;;  %424 = vmatpush1.bf16.msra.mxu1 %v794_v44 }
  0x8c   : > { %466 = vmatprep.subr.bf16.mxu0 %v795_v45  ;;  %425 = vmatprep.subr.bf16.mxu1 %v795_v45 }
  0x8f   : > { %467 = vmatpush1.bf16.msra.mxu0 %v797_v46  ;;  %426 = vmatpush1.bf16.msra.mxu1 %v797_v46 }
  0x90   : > { %468 = vmatprep.subr.bf16.mxu0 %v798_v47  ;;  %427 = vmatprep.subr.bf16.mxu1 %v798_v47 }
  0x93   : > { %469 = vmatpush1.bf16.msra.mxu0 %v800_v48  ;;  %428 = vmatpush1.bf16.msra.mxu1 %v800_v48 }
  0x94   : > { %479 = vmatprep.subr.bf16.mxu0 %v1104_v0 }
  0x96   : > { %471 = vmatmul.mubr.bf16.vlgmr.msra.gmra.mrb[0].mxu0 %v223_v28  ;;  %430 = vmatmul.mubr.bf16.vlgmr.msra.gmra.mrb[0].mxu1 %v235_v49 }
  0x97   : > { %480 = vmatpush1.bf16.msra.mxu0 %v1106_v1  ;;  %511 = vmatprep.mubr.bf16.mxu0 %v1162_v18 }
  0x98   : > { %481 = vmatprep.subr.bf16.mxu0 %v1109_v2 }
  0x9b   : > { %482 = vmatpush1.bf16.msra.mxu0 %v1113_v3 }
  0x9c   : > { %483 = vmatprep.subr.bf16.mxu0 %v1117_v4 }
  0x9f   : > { %484 = vmatpush1.bf16.msra.mxu0 %v1121_v5 }
  0xa0   : > { %485 = vmatprep.subr.bf16.mxu0 %v1125_v6 }
  0xa3   : > { %486 = vmatpush1.bf16.msra.mxu0 %v1129_v7 }
  0xa4   : > { %487 = vmatprep.subr.bf16.mxu0 %v1133_v8 }
  0xa7   : > { %488 = vmatpush1.bf16.msra.mxu0 %v1137_v9 }
  0xa8   : > { %489 = vmatprep.subr.bf16.mxu0 %v1141_v10 }
  0xab   : > { %490 = vmatpush1.bf16.msra.mxu0 %v1145_v11 }
  0xac   : > { %491 = vmatprep.subr.bf16.mxu0 %v1149_v12 }
  0xaf   : > { %492 = vmatpush1.bf16.msra.mxu0 %v1156_v16 }
  0xb0   : > { %493 = vmatprep.subr.bf16.mxu0 %v1160_v17 }
  0xb3   : > { %494 = vmatpush1.bf16.msra.mxu0 %v1168_v21 }
  0xb4   : > { %495 = vmatprep.subr.bf16.mxu0 %v1172_v22 }
  0xb7   : > { %496 = vmatpush1.bf16.msra.mxu0 %v1176_v25 }
  0xb8   : > { %497 = vmatprep.subr.bf16.mxu0 %v1180_v26 }
  0xbb   : > { %498 = vmatpush1.bf16.msra.mxu0 %v1184_v31 }
  0xbc   : > { %499 = vmatprep.subr.bf16.mxu0 %v1188_v32 }
  0xbf   : > { %500 = vmatpush1.bf16.msra.mxu0 %v1192_v35 }
  0xc0   : > { %501 = vmatprep.subr.bf16.mxu0 %v786_v36 }
  0xc3   : > { %502 = vmatpush1.bf16.msra.mxu0 %v788_v39 }
  0xc4   : > { %503 = vmatprep.subr.bf16.mxu0 %v789_v40 }
  0xc7   : > { %504 = vmatpush1.bf16.msra.mxu0 %v791_v42 }
  0xc8   : > { %505 = vmatprep.subr.bf16.mxu0 %v792_v43 }
  0xcb   : > { %506 = vmatpush1.bf16.msra.mxu0 %v794_v44 }
  0xcc   : > { %507 = vmatprep.subr.bf16.mxu0 %v795_v45 }
  0xcf   : > { %508 = vmatpush1.bf16.msra.mxu0 %v797_v46 }
  0xd0   : > { %509 = vmatprep.subr.bf16.mxu0 %v798_v47 }
  0xd3   : > { %510 = vmatpush1.bf16.msra.mxu0 %v800_v48 }
  0xd6   : > { %512 = vmatmul.mubr.bf16.vlgmr.msra.gmra.mrb[0].mxu0 %v1153_v15 }
 0x169   : > { %v431_v50 = vpop.f32.mrb[0].mxu1 }
 0x16a   : > { %v433_v51 = vpop.f32.mrb[1].mxu1 }
 0x16b   : > { %v435_v52 = vpop.f32.mrb[2].mxu1 }
 0x16c   : > { %v436_v53 = vpop.f32.mrb[3].mxu1 }
 0x1a9   : > { %v513_v54 = vpop.f32.mrb[0].mxu0 }
 0x1aa   : > { %v686_v55 = vadd.f32 %v513_v54, %v431_v50  ;;  %v515_v56 = vpop.f32.mrb[1].mxu0 }
 0x1ab   : > { %v687_v57 = vadd.f32 %v515_v56, %v433_v51  ;;  %v517_v58 = vpop.f32.mrb[2].mxu0 }
 0x1ac   : > { %v518_v59 = vpop.f32.mrb[3].mxu0  ;;  %523 = vrot.lane.b32.xlu0 %v686_v55, %s936_s17  ;;  %521 = vst.msk [vmem:[%s174_s27] sm:$0xf] %vm520_vm0, %v686_v55 }
 0x1ad   : > { %677 = vst.msk [vmem:[%s174_s27 + $0x8] sm:$0xf] %vm520_vm0, %v687_v57 }
 0x1b0   : > { %531 = vrot.lane.b32.xlu0 %v687_v57, %s936_s17 }
 0x21e   : > { %v524_v60 = vpop.permute.xlu0 %523 }
 0x21f   : > { %676 = vst.msk [vmem:[%s174_s27 + $0x4] sm:$0xf] %vm520_vm0, %v524_v60 }
 0x222   : > { %v532_v61 = vpop.permute.xlu0 %531 }
 0x223   : > { %678 = vst.msk [vmem:[%s174_s27 + $0xc] sm:$0xf] %vm520_vm0, %v532_v61 }
 0x224   : > { %873 = shalt.err (!%p870_p7)
}
 0x225   : > { %s874_s18 = scalar_lea.hbm %s1235_s3, 256  ;;  %s878_s26 = scalar_lea.hbm %s1284_s2, 512 }
 0x226   : > { %p875_p9 = scmp.ne.s32.totalorder %s1235_s3, %s874_s18  ;;  %p879_p0 = scmp.lt.u32.totalorder %s1235_s3, %s1284_s2 }
 0x227   : > { %p880_p11 = scmp.lt.u32.totalorder %s878_s26, %s874_s18  ;;  %p882_p4 = scmp.lt.u32.totalorder %s874_s18, %s1235_s3 }
 0x228   : > { %p876_p2 = pnand %p875_p9, %p1045_p12 }
 0x229   : > { %p881_p1 = por %p880_p11, %p879_p0 }
 0x22a   : > { %p877_p5 = pneg %p876_p2 }
 0x22b   : > { %p883_p6 = por %p882_p4, %p881_p1 }
 0x22d   : > { %p884_p8 = pnand %p883_p6, %p877_p5 }
 0x22f   : > { %887 = shalt.err (!%p884_p8)
}
 0x230   : > { %s938_s15 = smov 4  }
 0x231   : > { %698 = dma.vmem_to_hbm [thread:$0]  (%p1045_p12), %s1230_s22, 256, %s1235_s3, %s537_s4, %s936_s17, %s936_s17, %s938_s15  }
 0x232 PF: > { %s565_s27 = sand.u32 1, %s918_s9   ;;  %p1299_p10 = scmp.ne.s32.totalorder %s1289_s16, 0 }
 0x233   : > { %p1300_p13 = scmp.ge.s32.totalorder %s930_s12, 2  ;;  %s566_s23 = scalar_lea.sflag [#allocation4], %s565_s27 }
 0x235   : > { %p709_p3 = pnand %p1300_p13, %p1299_p10 }
 0x237   : > { %913 = dma.done.wait (!%p709_p3), %s566_s23, 256  }
 0x238   : > { %915 = vsyncadd (!%p709_p3), %s566_s23, 4294967040  ;;  %p16_p7 = scmp.ge.s32.totalorder %s1010_s21, 4   ;;  %s1301_s9 = smov %s922_s10 }
 0x239   : > { %s1302_s10 = smov %s926_s11  ;;  %s1303_s11 = smov %s1041_s8 }
 0x23a   : > { %s1304_s12 = smov %s1010_s21  ;;  %18 = sbr.rel (!%p16_p7) target bundleno = 6 (0x6), region = 80 }
 0x241   :  { %571 = vsyncpa [#allocation3], 1 }
 0x242   :  { %573 = vsyncpa [#allocation3 + $0x1], 1 }
 0x243   :  { %574 = vsyncpa [#allocation6], 1 }
 0x244   :  { %575 = vsyncpa [#allocation4], 1 }
 0x245   :  { %577 = vsyncpa [#allocation4 + $0x1], 1 }

</bundles_post_ra>
